<compile_context>
chip_gen: v7x
topology: tpu7x:2x2x1
jax: 0.10.0
libtpu: 0.0.40
codegen_flags: <defaults>
</compile_context>

<pallas_src>
import functools

import jax
import jax.numpy as jnp
from jax.experimental import pallas as pl
from jax.experimental.pallas import tpu as pltpu


_LANE = 128
_FAST_PATH_BYTES = 2 << 20      # below this, plain XLA reduce+sigmoid wins
_BLOCK_TARGET = 8 << 20         # ~8 MiB of (padded) input per grid step
_BLOCK_MAX = 16 << 20           # hard cap per block (x2 double-buffered)


def _round_up(x: int, m: int) -> int:
    return -(-x // m) * m


def _sublane(dtype) -> int:
    # f32 -> 8, bf16/f16 -> 16, int8/fp8 -> 32 rows per vreg.
    return max(8, 32 // max(1, jnp.dtype(dtype).itemsize))


def _padded_block_bytes(rows: int, cols: int, dtype) -> int:
    """VMEM footprint of a (rows, cols) block after (sublane, lane) padding."""
    itemsize = jnp.dtype(dtype).itemsize
    return _round_up(rows, _sublane(dtype)) * _round_up(cols, _LANE) * itemsize


# ---------------------------------------------------------------------------
# Kernels
# ---------------------------------------------------------------------------

def _agg_kernel(x_ref, o_ref, *, max_aggregate: bool):
    """Single-pass path: x_ref (TR, HW) -> o_ref (TR, 1)."""
    x = x_ref[...]
    if max_aggregate:
        # Max is exact in the input dtype; only the pooled column is upcast.
        pooled = jnp.max(x, axis=-1, keepdims=True).astype(jnp.float32)
    else:
        # f32 accumulation without materializing an upcast copy of the tile.
        pooled = jnp.mean(x, axis=-1, keepdims=True, dtype=jnp.float32)
    o_ref[...] = jax.nn.sigmoid(pooled).astype(o_ref.dtype)


def _agg_hw_tiled_kernel(x_ref, o_ref, acc_ref, *,
                         max_aggregate: bool, hw: int, thw: int):
    """Huge-row fallback: grid (rows, hw_chunks), running max/sum in scratch."""
    k = pl.program_id(1)

    @pl.when(k == 0)
    def _():
        init = -jnp.inf if max_aggregate else 0.0
        acc_ref[...] = jnp.full_like(acc_ref, init)

    x = x_ref[...].astype(jnp.float32)                       # (TR, THW)
    # Mask lanes past the true HW extent in the (possibly partial) last chunk.
    col = jax.lax.broadcasted_iota(jnp.int32, x.shape, 1)
    valid = (k * thw + col) < hw
    if max_aggregate:
        x = jnp.where(valid, x, -jnp.inf)
        acc_ref[...] = jnp.maximum(acc_ref[...],
                                   jnp.max(x, axis=-1, keepdims=True))
    else:
        x = jnp.where(valid, x, 0.0)
        acc_ref[...] = acc_ref[...] + jnp.sum(x, axis=-1, keepdims=True)

    @pl.when(k == pl.num_programs(1) - 1)
    def _():
        pooled = acc_ref[...]
        if not max_aggregate:
            pooled = pooled * (1.0 / hw)
        o_ref[...] = jax.nn.sigmoid(pooled).astype(o_ref.dtype)


# ---------------------------------------------------------------------------
# Block planning
# ---------------------------------------------------------------------------

def _plan_blocks(nr: int, hw: int, dtype, hw_block=None):
    """Return (tr, thw). thw is None for the single-pass (full-HW) path."""
    itemsize = jnp.dtype(dtype).itemsize
    sub = _sublane(dtype)

    def blk_bytes(rows, cols):
        return _round_up(rows, sub) * _round_up(cols, _LANE) * itemsize

    # Row tile must be a multiple of 128 (it is also the second-minor dim of
    # the (NR, 1) output tiling) or the full row extent.
    tr_min = nr if nr <= _LANE else _LANE

    hw_tiled = (hw_block is not None) or (blk_bytes(tr_min, hw) > _BLOCK_MAX)
    if hw_tiled:
        if hw_block is not None:
            thw = min(_round_up(int(hw_block), _LANE), _round_up(hw, _LANE))
        else:
            thw = max(_LANE,
                      (_BLOCK_TARGET // (_round_up(tr_min, sub) * itemsize))
                      // _LANE * _LANE)
        if thw >= hw:
            thw = hw              # full extent -> no partial lane chunk
        return tr_min, thw

    if nr <= _LANE:
        return nr, None           # single full-extent block of rows

    # Pack as many 128-row chunks per block as the padded-byte target allows,
    # then reshape the grid so (when enough chunks exist) there are >= 4
    # balanced, even steps: >= 2 pipelined steps per v7x TensorCore.
    chunk_bytes = blk_bytes(_LANE, hw)
    total_chunks = pl.cdiv(nr, _LANE)
    chunks_fit = min(max(1, _BLOCK_TARGET // chunk_bytes), total_chunks)
    steps = pl.cdiv(total_chunks, chunks_fit)
    if total_chunks >= 4 and steps < 4:
        steps = 4
    if steps % 2 == 1 and steps < total_chunks:
        steps += 1
    chunks_per_block = min(chunks_fit, pl.cdiv(total_chunks, steps))
    return int(chunks_per_block) * _LANE, None


# ---------------------------------------------------------------------------
# Public wrapper
# ---------------------------------------------------------------------------

def aggregator(x: jax.Array, *, max_aggregate: bool = True,
               force_pallas: bool = False, hw_block=None) -> jax.Array:
    """Pallas equivalent of Aggregator.forward (NCHW input -> (N, C) output).

    `hw_block` forces the HW-tiled fallback with the given chunk size (used
    for testing; normally chosen automatically only for huge H*W).
    """
    N, C, H, W = x.shape
    HW = H * W
    NR = N * C
    dtype = x.dtype
    total_bytes = x.size * jnp.dtype(dtype).itemsize

    # Tiny-input fast path: fixed pallas_call overhead dwarfs the data.
    # Numerics intentionally match the kernel (sigmoid in f32, then cast).
    if not force_pallas and hw_block is None and total_bytes < _FAST_PATH_BYTES:
        if max_aggregate:
            pooled = jnp.max(x, axis=(2, 3)).astype(jnp.float32)
        else:
            pooled = jnp.mean(x, axis=(2, 3), dtype=jnp.float32)
        return jax.nn.sigmoid(pooled).astype(dtype)

    # Collapse (N, C) into one row axis and (H, W) into the lane axis.
    # Free reshape on contiguous NCHW; removes the sublane padding a
    # (TN, C, HW) block pays when C < the dtype sublane count.
    x2 = x.reshape(NR, HW)

    tr, thw = _plan_blocks(NR, HW, dtype, hw_block=hw_block)

    if thw is None:
        blk = _padded_block_bytes(tr, HW, dtype)
        grid = (pl.cdiv(NR, tr),)
        in_specs = [pl.BlockSpec((tr, HW), lambda r: (r, 0))]
        out_specs = pl.BlockSpec((tr, 1), lambda r: (r, 0))
        scratch = ()
        kernel = functools.partial(_agg_kernel, max_aggregate=max_aggregate)
        semantics = ("parallel",)
    else:
        blk = _padded_block_bytes(tr, thw, dtype)
        grid = (pl.cdiv(NR, tr), pl.cdiv(HW, thw))
        in_specs = [pl.BlockSpec((tr, thw), lambda r, k: (r, k))]
        out_specs = pl.BlockSpec((tr, 1), lambda r, k: (r, 0))
        scratch = (pltpu.VMEM((tr, 1), jnp.float32),)
        kernel = functools.partial(_agg_hw_tiled_kernel,
                                   max_aggregate=max_aggregate,
                                   hw=HW, thw=thw)
        semantics = ("parallel", "arbitrary")

    # Scoped VMEM derived from the padded block size (double-buffered input
    # plus headroom for compiler scratch), capped well under v7x's 64 MiB.
    vmem_limit = int(min(48 << 20, max(16 << 20, int(2.5 * blk) + (2 << 20))))

    out = pl.pallas_call(
        kernel,
        out_shape=jax.ShapeDtypeStruct((NR, 1), dtype),
        grid_spec=pltpu.PrefetchScalarGridSpec(
            num_scalar_prefetch=0,
            grid=grid,
            in_specs=in_specs,
            out_specs=out_specs,
            scratch_shapes=scratch,
        ),
        compiler_params=pltpu.CompilerParams(
            dimension_semantics=semantics,
            vmem_limit_bytes=vmem_limit,
        ),
    )(x2)

    # Partial final row block: garbage rows are masked on store by Pallas;
    # safe only because the reduction is strictly per-row (see header note).
    # PyTorch `.squeeze()` would also drop N/C dims of size 1; we return the
    # canonical (N, C) slab.
    return out.reshape(N, C)


if __name__ == "__main__":
    key = jax.random.PRNGKey(0)
    k0, k1, k2 = jax.random.split(key, 3)

    # Small shape consistent with the module: batch=2, channels=4,
    # seq_len=8 (H), embedding_dim=32 (W).  force_pallas=True exercises the
    # kernel despite the tiny-input XLA fast path.
    N, C, SEQ, EMB = 2, 4, 8, 32
    x = jax.random.normal(k0, (N, C, SEQ, EMB), dtype=jnp.float32)

    out = jax.block_until_ready(aggregator(x, max_aggregate=True,
                                           force_pallas=True))
    ref = jax.nn.sigmoid(jnp.max(x, axis=(2, 3)))
    assert out.shape == (N, C), out.shape
    assert jnp.allclose(out, ref, atol=1e-6, rtol=1e-6)

    out_avg = jax.block_until_ready(aggregator(x, max_aggregate=False,
                                               force_pallas=True))
    ref_avg = jax.nn.sigmoid(jnp.mean(x, axis=(2, 3)))
    assert jnp.allclose(out_avg, ref_avg, atol=1e-6, rtol=1e-6)

    # Module defaults (seq_len=38, emb=32) with a batch that does not divide
    # the row tile -> multi-step grid + partial final row block.
    x2 = jax.random.normal(k1, (37, 8, 38, 32), dtype=jnp.float32)
    ref2 = jax.nn.sigmoid(jnp.max(x2, axis=(2, 3)))
    ref2a = jax.nn.sigmoid(jnp.mean(x2, axis=(2, 3)))

    out2 = jax.block_until_ready(aggregator(x2, max_aggregate=True,
                                            force_pallas=True))
    assert out2.shape == (37, 8), out2.shape
    assert jnp.allclose(out2, ref2, atol=1e-6, rtol=1e-6)

    out2a = jax.block_until_ready(aggregator(x2, max_aggregate=False,
                                             force_pallas=True))
    assert jnp.allclose(out2a, ref2a, atol=1e-5, rtol=1e-5)

    # Force the HW-tiled accumulator fallback at a small shape so it gets
    # compile/correctness-checked: THW=256 over HW=1216 -> 5 chunks, the last
    # one partial (masked in-kernel).
    out3 = jax.block_until_ready(aggregator(x2, max_aggregate=True,
                                            force_pallas=True, hw_block=256))
    assert jnp.allclose(out3, ref2, atol=1e-6, rtol=1e-6)
    out3a = jax.block_until_ready(aggregator(x2, max_aggregate=False,
                                             force_pallas=True, hw_block=256))
    assert jnp.allclose(out3a, ref2a, atol=1e-5, rtol=1e-5)

    # bf16: exercises the 16-sublane footprint math and dtype handling.
    xb = jax.random.normal(k2, (4, 4, 38, 32), dtype=jnp.bfloat16)
    outb = jax.block_until_ready(aggregator(xb, max_aggregate=True,
                                            force_pallas=True))
    refb = jax.nn.sigmoid(jnp.max(xb.astype(jnp.float32), axis=(2, 3)))
    assert outb.dtype == jnp.bfloat16
    assert jnp.allclose(outb.astype(jnp.float32), refb, atol=2e-2, rtol=2e-2)

    print("KERNEL_OK")
</pallas_src>

<mosaic_0001>
module attributes {stable_mosaic.version = 11 : i64} {
  func.func @_agg_kernel(%arg0: i32, %arg1: memref<8x256xf32, #tpu.memory_space<vmem>>, %arg2: memref<8x1xf32, #tpu.memory_space<vmem>>) attributes {dimension_semantics = [#tpu.dimension_semantics<parallel>], iteration_bounds = array<i64: 1>, scalar_prefetch = 0 : i64, scratch_operands = 0 : i64, tpu.core_type = #tpu.core_type<tc>, window_params = [{transform_indices = @transform_0, window_bounds = array<i64: 8, 256>}, {transform_indices = @transform_1, window_bounds = array<i64: 8, 1>}]} {
    %c0 = arith.constant 0 : index
    %c0_0 = arith.constant 0 : index
    %0 = vector.load %arg1[%c0, %c0_0] : memref<8x256xf32, #tpu.memory_space<vmem>>, vector<8x256xf32>
    %cst = arith.constant dense<0xFF800000> : vector<8xf32>
    %1 = vector.multi_reduction <maximumf>, %0, %cst [1] : vector<8x256xf32> to vector<8xf32>
    %2 = vector.shape_cast %1 : vector<8xf32> to vector<8x1xf32>
    %3 = arith.negf %2 : vector<8x1xf32>
    %4 = math.exp %3 : vector<8x1xf32>
    %cst_1 = arith.constant 1.000000e+00 : f32
    %5 = vector.broadcast %cst_1 : f32 to vector<8x1xf32>
    %6 = arith.addf %5, %4 : vector<8x1xf32>
    %7 = arith.divf %5, %6 : vector<8x1xf32>
    %c0_2 = arith.constant 0 : index
    %c0_3 = arith.constant 0 : index
    %8 = vector.load %arg2[%c0_2, %c0_3] : memref<8x1xf32, #tpu.memory_space<vmem>>, vector<8x1xf32>
    tpu.vector_store %arg2[%c0_2, %c0_3], %7 {strides = array<i32>} : memref<8x1xf32, #tpu.memory_space<vmem>>, vector<8x1xf32>,
    return
  }
  func.func @transform_0(%arg0: i32) -> (i32, i32) {
    %c0_i32 = arith.constant 0 : i32
    %c0_i32_0 = arith.constant 0 : i32
    return %arg0, %c0_i32 : i32, i32
  }
  func.func @transform_1(%arg0: i32) -> (i32, i32) {
    %c0_i32 = arith.constant 0 : i32
    %c0_i32_0 = arith.constant 0 : i32
    return %arg0, %c0_i32 : i32, i32
  }
}

</mosaic_0001>

<bundles_post_ra>
// kernel: tpu_custom_call.1
= control target key start
LH: loop header
LB: loop body
LE: loop exit
PB: predicated region body
PF: predicated region fallthrough
CT: control target
= control target key end

     0   :  { %6 = vsyncpa [#allocation3], 0  ;;  %s68_s6 = smov [#allocation2]   ;;  %s94_s0 = inlined_call_operand.hbm [shape: f32[8,256], index: 0, kind: input, shape index: {}]   ;;  %s95_s1 = inlined_call_operand.vmem [shape: f32[8,1], index: 1, kind: output, shape index: {}]  }
   0x1   :  { %s13_s7 = sshll.u32 %s68_s6, 4  ;;  %s44_s10 = scalar_lea.hbm %s94_s0, 256  ;;  %s14_s7 = int_to_ptr.vmem [resolvable:$true] %s13_s7 }
   0x2   :  { %p45_p0 = scmp.ne.s32.totalorder %s94_s0, %s44_s10  ;;  %p48_p1 = scmp.lt.u32.totalorder %s44_s10, %s94_s0 }
   0x4   :  { %p50_p2 = pnand %p48_p1, %p45_p0 }
   0x6   :  { %53 = shalt.err (!%p50_p2)
}
   0x7   :  { %s54_s15 = scalar_lea.vmem %s14_s7, 256  ;;  %p59_p4 = scmp.lt.s32.totalorder %s14_s7, %s14_s7 }
   0x8   :  { %p55_p3 = scmp.ne.s32.totalorder %s14_s7, %s54_s15  ;;  %p60_p5 = scmp.lt.s32.totalorder %s54_s15, %s54_s15 }
   0xa   :  { %p61_p6 = por %p60_p5, %p59_p4 }
   0xc   :  { %p62_p7 = pnand %p61_p6, %p55_p3 }
   0xe   :  { %65 = shalt.err (!%p62_p7)
}
   0xf   :  { %16 = dma.hbm_to_vmem [thread:$0]  %s94_s0, 256, %s14_s7, [#allocation3]  }
  0x10   :  { %66 = dma.done.wait [#allocation3], 256  }
  0x11   :  { %67 = vsyncadd [#allocation3], 4294967040  ;;  %v20_v0 = vld [vmem:[#allocation2] sm:$0xff]  ;;  %v21_v1 = vld [vmem:[#allocation2 + $0x8] sm:$0xff]  ;;  %vm31_vm0 = vcmask 7168  }
  0x12   :  { %v22_v2 = vmax.f32 %v20_v0, %v21_v1 }
  0x14   :  { %23 = vmax.xlane.f32.xlu0 %v22_v2 }
  0xa1   :  { %v24_v3 = vpop.xlane.xlu0 %23 }
  0xa2   :  { %v38_v4 = vmul.f32 -1.442695, %v24_v3 }
  0xa4   :  { %40 = vpow2.f32 %v38_v4 }
  0xae   :  { %v41_v5 = vpop.eup %40 }
  0xaf   :  { %v28_v6 = vadd.f32 1.0, %v41_v5 }
  0xb1   :  { %42 = vrcp.f32 %v28_v6 }
  0xbb   :  { %v43_v7 = vpop.eup %42 }
  0xbc   :  { %32 = vst.msk [vmem:[%s95_s1] sm:$0xff] %vm31_vm0, %v43_v7 }
  0xbd   :  { %37 = vsyncpa [#allocation3], 1 }

</bundles_post_ra>
